<compile_context>
chip_gen: v7x
topology: tpu7x:2x2x1
jax: 0.10.0
libtpu: 0.0.40
codegen_flags: <defaults>
</compile_context>

<pallas_src>
import functools

import jax
import jax.numpy as jnp
from jax.experimental import pallas as pl
from jax.experimental.pallas import tpu as pltpu

_LANE = 128
_ROW_ALIGN = 16          # covers bf16 (16-row) and f32 (8-row) sublane packing
_TM_MAX = 2048           # ~(64 KiB x + 512 KiB out) per tile -> tiny VMEM use


def _round_up(x, m):
    return ((x + m - 1) // m) * m


def _mlp_kernel(x_ref,
                w1_ref, b1_ref,
                w2_ref, b2_ref,
                w3_ref, b3_ref,
                w4_ref, b4_ref,
                w5_ref, b5_ref,
                o_ref):
    """Fused 5x (bf16 matmul -> f32 bias + ReLU) on one (TM, D) row tile."""
    h = x_ref[...]                                   # bf16 (TM, 16), unpadded lanes

    def layer(h_bf16, w_ref, b_ref):
        # bf16 x bf16 on the MXU, f32 accumulation.
        y = jnp.dot(h_bf16, w_ref[...], preferred_element_type=jnp.float32)
        # f32 epilogue (bias + ReLU) -- f32 VPU path works on all chips.
        return jnp.maximum(y + b_ref[...], 0.0)

    h = layer(h, w1_ref, b1_ref)
    h = layer(h.astype(jnp.bfloat16), w2_ref, b2_ref)
    h = layer(h.astype(jnp.bfloat16), w3_ref, b3_ref)
    h = layer(h.astype(jnp.bfloat16), w4_ref, b4_ref)
    h = layer(h.astype(jnp.bfloat16), w5_ref, b5_ref)
    o_ref[...] = h.astype(o_ref.dtype)               # bf16, lane-dense (TM, 128)


def prepare_params(params):
    """Pad to lane multiples of 128 and cast ONCE (call outside the jit path).

    First-layer fan-in (the x feature dim) is left unpadded — the kernel's x
    block carries the full (small) last dim instead. Padded weight rows/cols
    and padded bias lanes are 0, so padded lanes stay exactly 0 through ReLU.
    Returns a flat tuple (w1, b1, ..., w5, b5): weights bf16, biases f32.
    """
    flat = []
    for i, (w, b) in enumerate(params):
        fan_in, fan_out = w.shape
        pin = fan_in if i == 0 else _round_up(fan_in, _LANE)
        pout = _round_up(fan_out, _LANE)
        w_p = jnp.zeros((pin, pout), jnp.bfloat16)
        w_p = w_p.at[:fan_in, :fan_out].set(w.astype(jnp.bfloat16))
        b_p = jnp.zeros((1, pout), jnp.float32)
        b_p = b_p.at[:, :fan_out].set(b.astype(jnp.float32))
        flat.extend([w_p, b_p])
    return tuple(flat)


def _choose_tiling(n):
    """Pick (tm, n_pad, num_tiles): big tiles, bounded padding, >=2 grid steps
    when the batch is large enough (so v7x's two TensorCores both work)."""
    num_tiles = max(1, pl.cdiv(n, _TM_MAX))
    if num_tiles == 1 and n > _ROW_ALIGN:
        num_tiles = 2
    tm = _round_up(pl.cdiv(n, num_tiles), _ROW_ALIGN)
    n_pad = tm * num_tiles
    return tm, n_pad, num_tiles


@functools.partial(jax.jit, static_argnames=("num_classes",))
def simple_network_forward(x, flat_params, *, num_classes):
    """x: (N, D) f32. flat_params: output of prepare_params. Returns (N, C) f32."""
    n, d = x.shape
    assert flat_params[0].shape[0] == d, "x feature dim must match fc1 fan-in"
    h_out = flat_params[-2].shape[1]                 # padded class width (128)

    tm, n_pad, num_tiles = _choose_tiling(n)

    x_bf = x.astype(jnp.bfloat16)
    if n_pad != n:
        x_bf = jnp.pad(x_bf, ((0, n_pad - n), (0, 0)))

    # BlockSpecs: x/out tiled over the batch; weights/biases resident (0, 0).
    # x block last dim == full array dim (16), so no 128-lane padding needed.
    in_specs = [pl.BlockSpec((tm, d), lambda i: (i, 0))]
    for j in range(0, len(flat_params), 2):
        w, b = flat_params[j], flat_params[j + 1]
        in_specs.append(pl.BlockSpec(w.shape, lambda i: (0, 0)))
        in_specs.append(pl.BlockSpec(b.shape, lambda i: (0, 0)))
    out_spec = pl.BlockSpec((tm, h_out), lambda i: (i, 0))

    # Advisory cost estimate — actual padded traffic & flops.
    flops = 2 * n_pad * sum(flat_params[j].shape[0] * flat_params[j].shape[1]
                            for j in range(0, len(flat_params), 2))
    bytes_accessed = (x_bf.size * 2
                      + sum(p.size * p.dtype.itemsize for p in flat_params)
                      + n_pad * h_out * 2)

    out_padded = pl.pallas_call(
        _mlp_kernel,
        out_shape=jax.ShapeDtypeStruct((n_pad, h_out), jnp.bfloat16),
        grid=(num_tiles,),
        in_specs=in_specs,
        out_specs=out_spec,
        compiler_params=pltpu.CompilerParams(
            dimension_semantics=("parallel",),        # megacore on v7x
            vmem_limit_bytes=32 * 1024 * 1024,        # >> actual ~1.5 MiB need
        ),
        cost_estimate=pl.CostEstimate(
            flops=flops, transcendentals=0, bytes_accessed=bytes_accessed),
    )(x_bf, *flat_params)

    return out_padded[:n, :num_classes].astype(jnp.float32)


def init_params(key, input_size, num_classes, hidden_size=(32, 32, 32, 32)):
    """PyTorch nn.Linear-style uniform(-1/sqrt(fan_in), 1/sqrt(fan_in)) init.

    Weights stored as (in, out) == transpose of PyTorch's (out, in)."""
    dims = [input_size, *hidden_size, num_classes]
    params = []
    for i in range(len(dims) - 1):
        fan_in, fan_out = dims[i], dims[i + 1]
        key, kw, kb = jax.random.split(key, 3)
        bound = 1.0 / (fan_in ** 0.5)
        w = jax.random.uniform(kw, (fan_in, fan_out), jnp.float32, -bound, bound)
        b = jax.random.uniform(kb, (1, fan_out), jnp.float32, -bound, bound)
        params.append((w, b))
    return tuple(params)


def reference_forward_f32(x, params):
    h = x
    for w, b in params:
        h = jnp.maximum(h @ w + b, 0.0)
    return h


def reference_forward_bf16(x, params):
    """Pure-JAX reference with the kernel's numerics
    (bf16 matmul inputs, f32 accumulate, f32 bias+ReLU)."""
    h = x.astype(jnp.float32)
    for w, b in params:
        y = jnp.dot(h.astype(jnp.bfloat16), w.astype(jnp.bfloat16),
                    preferred_element_type=jnp.float32)
        h = jnp.maximum(y + b, 0.0)
    return h


if __name__ == "__main__":
    key = jax.random.PRNGKey(0)
    kx, kp = jax.random.split(key)

    D, C = 16, 10                                    # (N, D) -> (N, C) logits
    params = init_params(kp, input_size=D, num_classes=C)
    flat_params = prepare_params(params)             # pad/cast once, outside jit

    for N in (64, 5):                                # 2-tile grid + ragged batch
        x = jax.random.normal(jax.random.fold_in(kx, N), (N, D), jnp.float32)
        out = jax.block_until_ready(
            simple_network_forward(x, flat_params, num_classes=C))
        assert out.shape == (N, C)

        ref_bf16 = reference_forward_bf16(x, params)  # numerics-matched reference
        ref_f32 = reference_forward_f32(x, params)    # full-f32 sanity reference
        ref_bf16_out = ref_bf16.astype(jnp.bfloat16).astype(jnp.float32)
        assert jnp.allclose(out, ref_bf16_out, atol=2e-2, rtol=2e-2), \
            f"mismatch vs bf16 ref (N={N})"
        assert jnp.allclose(out, ref_f32, atol=5e-2, rtol=5e-2), \
            f"mismatch vs f32 ref (N={N})"

    print("KERNEL_OK")
</pallas_src>

<mosaic_0001>
module attributes {stable_mosaic.version = 11 : i64} {
  func.func @_mlp_kernel(%arg0: i32, %arg1: memref<32x16xbf16, #tpu.memory_space<vmem>>, %arg2: memref<16x128xbf16, #tpu.memory_space<vmem>>, %arg3: memref<1x128xf32, #tpu.memory_space<vmem>>, %arg4: memref<128x128xbf16, #tpu.memory_space<vmem>>, %arg5: memref<1x128xf32, #tpu.memory_space<vmem>>, %arg6: memref<128x128xbf16, #tpu.memory_space<vmem>>, %arg7: memref<1x128xf32, #tpu.memory_space<vmem>>, %arg8: memref<128x128xbf16, #tpu.memory_space<vmem>>, %arg9: memref<1x128xf32, #tpu.memory_space<vmem>>, %arg10: memref<128x128xbf16, #tpu.memory_space<vmem>>, %arg11: memref<1x128xf32, #tpu.memory_space<vmem>>, %arg12: memref<32x128xbf16, #tpu.memory_space<vmem>>) attributes {dimension_semantics = [#tpu.dimension_semantics<parallel>], iteration_bounds = array<i64: 2>, scalar_prefetch = 0 : i64, scratch_operands = 0 : i64, tpu.core_type = #tpu.core_type<tc>, window_params = [{transform_indices = @transform_0, window_bounds = array<i64: 32, 16>}, {pipeline_mode = #tpu.pipeline_mode<synchronous>, transform_indices = @transform_1, window_bounds = array<i64: 16, 128>}, {pipeline_mode = #tpu.pipeline_mode<synchronous>, transform_indices = @transform_2, window_bounds = array<i64: 1, 128>}, {pipeline_mode = #tpu.pipeline_mode<synchronous>, transform_indices = @transform_3, window_bounds = array<i64: 128, 128>}, {pipeline_mode = #tpu.pipeline_mode<synchronous>, transform_indices = @transform_4, window_bounds = array<i64: 1, 128>}, {pipeline_mode = #tpu.pipeline_mode<synchronous>, transform_indices = @transform_5, window_bounds = array<i64: 128, 128>}, {pipeline_mode = #tpu.pipeline_mode<synchronous>, transform_indices = @transform_6, window_bounds = array<i64: 1, 128>}, {pipeline_mode = #tpu.pipeline_mode<synchronous>, transform_indices = @transform_7, window_bounds = array<i64: 128, 128>}, {pipeline_mode = #tpu.pipeline_mode<synchronous>, transform_indices = @transform_8, window_bounds = array<i64: 1, 128>}, {pipeline_mode = #tpu.pipeline_mode<synchronous>, transform_indices = @transform_9, window_bounds = array<i64: 128, 128>}, {pipeline_mode = #tpu.pipeline_mode<synchronous>, transform_indices = @transform_10, window_bounds = array<i64: 1, 128>}, {transform_indices = @transform_11, window_bounds = array<i64: 32, 128>}]} {
    %c0 = arith.constant 0 : index
    %c0_0 = arith.constant 0 : index
    %0 = vector.load %arg1[%c0, %c0_0] : memref<32x16xbf16, #tpu.memory_space<vmem>>, vector<32x16xbf16>
    %c0_1 = arith.constant 0 : index
    %c0_2 = arith.constant 0 : index
    %1 = vector.load %arg2[%c0_1, %c0_2] : memref<16x128xbf16, #tpu.memory_space<vmem>>, vector<16x128xbf16>
    %cst = arith.constant dense<0.000000e+00> : vector<32x128xf32>
    %2 = tpu.matmul %0, %1, %cst {dimension_numbers = #tpu.dot_dimension_numbers<[1], [0], [0], [1], [0, 0, 1, 1], [], []>} : vector<32x16xbf16>, vector<16x128xbf16>, vector<32x128xf32> -> vector<32x128xf32>
    %c0_3 = arith.constant 0 : index
    %c0_4 = arith.constant 0 : index
    %3 = vector.load %arg3[%c0_3, %c0_4] : memref<1x128xf32, #tpu.memory_space<vmem>>, vector<1x128xf32>
    %4 = vector.broadcast %3 : vector<1x128xf32> to vector<32x128xf32>
    %5 = arith.addf %2, %4 : vector<32x128xf32>
    %cst_5 = arith.constant 0.000000e+00 : f32
    %6 = vector.broadcast %cst_5 : f32 to vector<32x128xf32>
    %7 = arith.maximumf %5, %6 : vector<32x128xf32>
    %8 = arith.truncf %7 : vector<32x128xf32> to vector<32x128xbf16>
    %c0_6 = arith.constant 0 : index
    %c0_7 = arith.constant 0 : index
    %9 = vector.load %arg4[%c0_6, %c0_7] : memref<128x128xbf16, #tpu.memory_space<vmem>>, vector<128x128xbf16>
    %cst_8 = arith.constant dense<0.000000e+00> : vector<32x128xf32>
    %10 = tpu.matmul %8, %9, %cst_8 {dimension_numbers = #tpu.dot_dimension_numbers<[1], [0], [0], [1], [0, 0, 1, 1], [], []>} : vector<32x128xbf16>, vector<128x128xbf16>, vector<32x128xf32> -> vector<32x128xf32>
    %c0_9 = arith.constant 0 : index
    %c0_10 = arith.constant 0 : index
    %11 = vector.load %arg5[%c0_9, %c0_10] : memref<1x128xf32, #tpu.memory_space<vmem>>, vector<1x128xf32>
    %12 = vector.broadcast %11 : vector<1x128xf32> to vector<32x128xf32>
    %13 = arith.addf %10, %12 : vector<32x128xf32>
    %cst_11 = arith.constant 0.000000e+00 : f32
    %14 = vector.broadcast %cst_11 : f32 to vector<32x128xf32>
    %15 = arith.maximumf %13, %14 : vector<32x128xf32>
    %16 = arith.truncf %15 : vector<32x128xf32> to vector<32x128xbf16>
    %c0_12 = arith.constant 0 : index
    %c0_13 = arith.constant 0 : index
    %17 = vector.load %arg6[%c0_12, %c0_13] : memref<128x128xbf16, #tpu.memory_space<vmem>>, vector<128x128xbf16>
    %cst_14 = arith.constant dense<0.000000e+00> : vector<32x128xf32>
    %18 = tpu.matmul %16, %17, %cst_14 {dimension_numbers = #tpu.dot_dimension_numbers<[1], [0], [0], [1], [0, 0, 1, 1], [], []>} : vector<32x128xbf16>, vector<128x128xbf16>, vector<32x128xf32> -> vector<32x128xf32>
    %c0_15 = arith.constant 0 : index
    %c0_16 = arith.constant 0 : index
    %19 = vector.load %arg7[%c0_15, %c0_16] : memref<1x128xf32, #tpu.memory_space<vmem>>, vector<1x128xf32>
    %20 = vector.broadcast %19 : vector<1x128xf32> to vector<32x128xf32>
    %21 = arith.addf %18, %20 : vector<32x128xf32>
    %cst_17 = arith.constant 0.000000e+00 : f32
    %22 = vector.broadcast %cst_17 : f32 to vector<32x128xf32>
    %23 = arith.maximumf %21, %22 : vector<32x128xf32>
    %24 = arith.truncf %23 : vector<32x128xf32> to vector<32x128xbf16>
    %c0_18 = arith.constant 0 : index
    %c0_19 = arith.constant 0 : index
    %25 = vector.load %arg8[%c0_18, %c0_19] : memref<128x128xbf16, #tpu.memory_space<vmem>>, vector<128x128xbf16>
    %cst_20 = arith.constant dense<0.000000e+00> : vector<32x128xf32>
    %26 = tpu.matmul %24, %25, %cst_20 {dimension_numbers = #tpu.dot_dimension_numbers<[1], [0], [0], [1], [0, 0, 1, 1], [], []>} : vector<32x128xbf16>, vector<128x128xbf16>, vector<32x128xf32> -> vector<32x128xf32>
    %c0_21 = arith.constant 0 : index
    %c0_22 = arith.constant 0 : index
    %27 = vector.load %arg9[%c0_21, %c0_22] : memref<1x128xf32, #tpu.memory_space<vmem>>, vector<1x128xf32>
    %28 = vector.broadcast %27 : vector<1x128xf32> to vector<32x128xf32>
    %29 = arith.addf %26, %28 : vector<32x128xf32>
    %cst_23 = arith.constant 0.000000e+00 : f32
    %30 = vector.broadcast %cst_23 : f32 to vector<32x128xf32>
    %31 = arith.maximumf %29, %30 : vector<32x128xf32>
    %32 = arith.truncf %31 : vector<32x128xf32> to vector<32x128xbf16>
    %c0_24 = arith.constant 0 : index
    %c0_25 = arith.constant 0 : index
    %33 = vector.load %arg10[%c0_24, %c0_25] : memref<128x128xbf16, #tpu.memory_space<vmem>>, vector<128x128xbf16>
    %cst_26 = arith.constant dense<0.000000e+00> : vector<32x128xf32>
    %34 = tpu.matmul %32, %33, %cst_26 {dimension_numbers = #tpu.dot_dimension_numbers<[1], [0], [0], [1], [0, 0, 1, 1], [], []>} : vector<32x128xbf16>, vector<128x128xbf16>, vector<32x128xf32> -> vector<32x128xf32>
    %c0_27 = arith.constant 0 : index
    %c0_28 = arith.constant 0 : index
    %35 = vector.load %arg11[%c0_27, %c0_28] : memref<1x128xf32, #tpu.memory_space<vmem>>, vector<1x128xf32>
    %36 = vector.broadcast %35 : vector<1x128xf32> to vector<32x128xf32>
    %37 = arith.addf %34, %36 : vector<32x128xf32>
    %cst_29 = arith.constant 0.000000e+00 : f32
    %38 = vector.broadcast %cst_29 : f32 to vector<32x128xf32>
    %39 = arith.maximumf %37, %38 : vector<32x128xf32>
    %40 = arith.truncf %39 : vector<32x128xf32> to vector<32x128xbf16>
    %c0_30 = arith.constant 0 : index
    %c0_31 = arith.constant 0 : index
    %41 = vector.load %arg12[%c0_30, %c0_31] : memref<32x128xbf16, #tpu.memory_space<vmem>>, vector<32x128xbf16>
    tpu.vector_store %arg12[%c0_30, %c0_31], %40 {strides = array<i32>} : memref<32x128xbf16, #tpu.memory_space<vmem>>, vector<32x128xbf16>,
    return
  }
  func.func @transform_0(%arg0: i32) -> (i32, i32) {
    %c0_i32 = arith.constant 0 : i32
    %c0_i32_0 = arith.constant 0 : i32
    return %arg0, %c0_i32 : i32, i32
  }
  func.func @transform_1(%arg0: i32) -> (i32, i32) {
    %c0_i32 = arith.constant 0 : i32
    %c0_i32_0 = arith.constant 0 : i32
    %c0_i32_1 = arith.constant 0 : i32
    return %c0_i32, %c0_i32_0 : i32, i32
  }
  func.func @transform_2(%arg0: i32) -> (i32, i32) {
    %c0_i32 = arith.constant 0 : i32
    %c0_i32_0 = arith.constant 0 : i32
    %c0_i32_1 = arith.constant 0 : i32
    return %c0_i32, %c0_i32_0 : i32, i32
  }
  func.func @transform_3(%arg0: i32) -> (i32, i32) {
    %c0_i32 = arith.constant 0 : i32
    %c0_i32_0 = arith.constant 0 : i32
    %c0_i32_1 = arith.constant 0 : i32
    return %c0_i32, %c0_i32_0 : i32, i32
  }
  func.func @transform_4(%arg0: i32) -> (i32, i32) {
    %c0_i32 = arith.constant 0 : i32
    %c0_i32_0 = arith.constant 0 : i32
    %c0_i32_1 = arith.constant 0 : i32
    return %c0_i32, %c0_i32_0 : i32, i32
  }
  func.func @transform_5(%arg0: i32) -> (i32, i32) {
    %c0_i32 = arith.constant 0 : i32
    %c0_i32_0 = arith.constant 0 : i32
    %c0_i32_1 = arith.constant 0 : i32
    return %c0_i32, %c0_i32_0 : i32, i32
  }
  func.func @transform_6(%arg0: i32) -> (i32, i32) {
    %c0_i32 = arith.constant 0 : i32
    %c0_i32_0 = arith.constant 0 : i32
    %c0_i32_1 = arith.constant 0 : i32
    return %c0_i32, %c0_i32_0 : i32, i32
  }
  func.func @transform_7(%arg0: i32) -> (i32, i32) {
    %c0_i32 = arith.constant 0 : i32
    %c0_i32_0 = arith.constant 0 : i32
    %c0_i32_1 = arith.constant 0 : i32
    return %c0_i32, %c0_i32_0 : i32, i32
  }
  func.func @transform_8(%arg0: i32) -> (i32, i32) {
    %c0_i32 = arith.constant 0 : i32
    %c0_i32_0 = arith.constant 0 : i32
    %c0_i32_1 = arith.constant 0 : i32
    return %c0_i32, %c0_i32_0 : i32, i32
  }
  func.func @transform_9(%arg0: i32) -> (i32, i32) {
    %c0_i32 = arith.constant 0 : i32
    %c0_i32_0 = arith.constant 0 : i32
    %c0_i32_1 = arith.constant 0 : i32
    return %c0_i32, %c0_i32_0 : i32, i32
  }
  func.func @transform_10(%arg0: i32) -> (i32, i32) {
    %c0_i32 = arith.constant 0 : i32
    %c0_i32_0 = arith.constant 0 : i32
    %c0_i32_1 = arith.constant 0 : i32
    return %c0_i32, %c0_i32_0 : i32, i32
  }
  func.func @transform_11(%arg0: i32) -> (i32, i32) {
    %c0_i32 = arith.constant 0 : i32
    %c0_i32_0 = arith.constant 0 : i32
    return %arg0, %c0_i32 : i32, i32
  }
}

</mosaic_0001>

<bundles_post_ra>
// kernel: simple_network_forward.1
= control target key start
LH: loop header
LB: loop body
LE: loop exit
PB: predicated region body
PF: predicated region fallthrough
CT: control target
= control target key end

     0   :  { %16 = vsyncpa [#allocation3], 0  ;;  %s1762_s0 = inlined_call_operand.vmem [shape: bf16[64,16], index: 0, kind: input, shape index: {}]   ;;  %s1763_s1 = inlined_call_operand.vmem [shape: bf16[16,128], index: 1, kind: input, shape index: {}]   ;;  %s1764_s2 = inlined_call_operand.vmem [shape: f32[1,128], index: 2, kind: input, shape index: {}]   ;;  %s1765_s3 = inlined_call_operand.vmem [shape: bf16[128,128], index: 3, kind: input, shape index: {}]   ;;  %s1766_s4 = inlined_call_operand.vmem [shape: f32[1,128], index: 4, kind: input, shape index: {}]   ;;  %s1767_s5 = inlined_call_operand.hbm [shape: bf16[128,128], index: 5, kind: input, shape index: {}]   ;;  %s1768_s6 = inlined_call_operand.vmem [shape: f32[1,128], index: 6, kind: input, shape index: {}]   ;;  %s1769_s7 = inlined_call_operand.hbm [shape: bf16[128,128], index: 7, kind: input, shape index: {}]   ;;  %s1770_s8 = inlined_call_operand.vmem [shape: f32[1,128], index: 8, kind: input, shape index: {}]   ;;  %s1771_s9 = inlined_call_operand.hbm [shape: bf16[128,128], index: 9, kind: input, shape index: {}]   ;;  %s1772_s10 = inlined_call_operand.vmem [shape: f32[1,128], index: 10, kind: input, shape index: {}]   ;;  %s1773_s11 = inlined_call_operand.vmem [shape: bf16[64,128], index: 11, kind: output, shape index: {}]  }
   0x1   :  { %17 = vsyncpa [#allocation5], 0  ;;  %s1583_s17 = smov 0  }
   0x2 LB: > { %s1777_s18 = sadd.s32 4294967295, %s1516_s17   ;;  %p1137_p0 = scmp.ge.s32.totalorder %s1516_s17, 1  ;;  %s1516_s17 = sphi %s1583_s17, %s23_s17  }
   0x3   : > { %p290_p1 = scmp.lt.s32.totalorder %s1516_s17, 3  ;;  %p1593_p2 = scmp.eq.s32.totalorder %s1777_s18, 0 }
   0x4   : > { %s1518_s21 = smov [#allocation4]   ;;  %s1519_s23 = smov [#allocation2]  }
   0x5   : > { %s1778_s19 = scalar_select %p1593_p2, 1, 0 }
   0x6   : > { %p1597_p3 = pnand %p1137_p0, %p290_p1  ;;  %s330_s22 = sshll.u32 %s1518_s21, 4  ;;  %s331_s22 = int_to_ptr.vmem [resolvable:$true] %s330_s22 }
   0x7   : > { %s314_s24 = sshll.u32 %s1519_s23, 4  ;;  %s1520_s26 = smov [#allocation6]   ;;  %s1609_s24 = int_to_ptr.vmem [resolvable:$true] %s314_s24 }
   0x8   : > { %s1779_s20 = scalar_select %p1597_p3, 1, 0 }
   0x9   : > { %p1354_p4 = pneg %p1597_p3  ;;  %s346_s27 = sshll.u32 %s1520_s26, 4  ;;  %s1611_s27 = int_to_ptr.vmem [resolvable:$true] %s346_s27 }
   0xa   : > { %s1418_s30 = scalar_lea.hbm %s1769_s7, 1024 }
   0xb   : > { %p1605_p5 = pnand %p1593_p2, %p1354_p4  ;;  %p1419_p6 = scmp.ne.s32.totalorder %s1769_s7, %s1418_s30 }
   0xc   : > { %p1425_p10 = scmp.lt.u32.totalorder %s1418_s30, %s1769_s7 }
   0xd   : > { %p1621_p7 = pneg %p1605_p5 }
   0xf   : > { %p1421_p8 = pnand %p1621_p7, %p1419_p6 }
  0x11   : > { %p1422_p9 = pneg %p1421_p8 }
  0x13   : > { %p1427_p11 = pnand %p1425_p10, %p1422_p9 }
  0x15   : > { %1430 = shalt.err (!%p1427_p11)
}
  0x16   : > { %s1431_s21 = scalar_lea.vmem %s331_s22, 1024  ;;  %p1439_p1 = scmp.lt.s32.totalorder %s331_s22, %s331_s22 }
  0x17   : > { %p1432_p12 = scmp.ne.s32.totalorder %s331_s22, %s1431_s21  ;;  %p1440_p4 = scmp.lt.s32.totalorder %s1431_s21, %s1431_s21 }
  0x19   : > { %p1434_p13 = pnand %p1432_p12, %p1621_p7  ;;  %p1441_p2 = por %p1440_p4, %p1439_p1 }
  0x1b   : > { %p1435_p0 = pneg %p1434_p13 }
  0x1d   : > { %p1442_p3 = pnand %p1441_p2, %p1435_p0 }
  0x1f   : > { %1445 = shalt.err (!%p1442_p3)
}
  0x20   : > { %s1521_s23 = smov 64   ;;  %s1522_s26 = smov 4  }
  0x21   : > { %1360 = dma.hbm_to_vmem [thread:$0]  (!%p1605_p5), %s1769_s7, 1024, %s331_s22, [#allocation5], %s1521_s23, %s1521_s23, %s1522_s26  }
  0x22   : > { %s1446_s13 = scalar_lea.hbm %s1767_s5, 1024 }
  0x23   : > { %p1447_p2 = scmp.ne.s32.totalorder %s1767_s5, %s1446_s13  ;;  %p1453_p8 = scmp.lt.u32.totalorder %s1446_s13, %s1767_s5 }
  0x25   : > { %p1449_p3 = pnand %p1447_p2, %p1621_p7 }
  0x27   : > { %p1450_p6 = pneg %p1449_p3 }
  0x29   : > { %p1455_p9 = pnand %p1453_p8, %p1450_p6 }
  0x2b   : > { %1458 = shalt.err (!%p1455_p9)
}
  0x2c   : > { %s1459_s22 = scalar_lea.vmem %s1609_s24, 1024  ;;  %p1467_p13 = scmp.lt.s32.totalorder %s1609_s24, %s1609_s24 }
  0x2d   : > { %p1460_p10 = scmp.ne.s32.totalorder %s1609_s24, %s1459_s22  ;;  %p1468_p0 = scmp.lt.s32.totalorder %s1459_s22, %s1459_s22 }
  0x2f   : > { %p1462_p11 = pnand %p1460_p10, %p1621_p7  ;;  %p1469_p1 = por %p1468_p0, %p1467_p13 }
  0x31   : > { %p1463_p12 = pneg %p1462_p11 }
  0x33   : > { %p1470_p4 = pnand %p1469_p1, %p1463_p12 }
  0x35   : > { %1473 = shalt.err (!%p1470_p4)
}
  0x36   : > { %1357 = dma.hbm_to_vmem [thread:$0]  (!%p1605_p5), %s1767_s5, 1024, %s1609_s24, [#allocation3], %s1521_s23, %s1521_s23, %s1522_s26  }
  0x37   : > { %s1474_s12 = scalar_lea.hbm %s1771_s9, 1024 }
  0x38   : > { %p1475_p2 = scmp.ne.s32.totalorder %s1771_s9, %s1474_s12  ;;  %p1481_p8 = scmp.lt.u32.totalorder %s1474_s12, %s1771_s9 }
  0x3a   : > { %p1477_p3 = pnand %p1475_p2, %p1621_p7 }
  0x3c   : > { %p1478_p6 = pneg %p1477_p3 }
  0x3e   : > { %p1483_p9 = pnand %p1481_p8, %p1478_p6 }
  0x40   : > { %1486 = shalt.err (!%p1483_p9)
}
  0x41   : > { %s1487_s24 = scalar_lea.vmem %s1611_s27, 1024  ;;  %p1495_p13 = scmp.lt.s32.totalorder %s1611_s27, %s1611_s27 }
  0x42   : > { %p1488_p10 = scmp.ne.s32.totalorder %s1611_s27, %s1487_s24  ;;  %p1496_p0 = scmp.lt.s32.totalorder %s1487_s24, %s1487_s24 }
  0x44   : > { %p1490_p11 = pnand %p1488_p10, %p1621_p7  ;;  %p1497_p1 = por %p1496_p0, %p1495_p13 }
  0x46   : > { %p1491_p12 = pneg %p1490_p11 }
  0x48   : > { %p1498_p4 = pnand %p1497_p1, %p1491_p12 }
  0x4a   : > { %1501 = shalt.err (!%p1498_p4)
}
  0x4b   : > { %1363 = dma.hbm_to_vmem [thread:$0]  (!%p1605_p5), %s1771_s9, 1024, %s1611_s27, [#allocation5], %s1521_s23, %s1521_s23, %s1522_s26  }
  0x4c   : > { %p1782_p2 = scmp.ne.s32.totalorder %s1779_s20, 0 }
  0x4d   : > { %p1783_p7 = scmp.ne.s32.totalorder (!%p1782_p2), %s1778_s19, 0 }
  0x4e   : > { %374 = sbr.rel (%p1782_p2) target bundleno = 1207 (0x4b7), region = 64 }
  0x55   : > { %1507 = dma.done.wait (%p1783_p7), [#allocation3], 1024  }
  0x56   : > { %1509 = vsyncadd (%p1783_p7), [#allocation3], 4294966272 }
  0x57   : > { %1511 = dma.done.wait (%p1783_p7), [#allocation5], 2048  }
  0x58   : > { %1513 = vsyncadd (%p1783_p7), [#allocation5], 4294965248  ;;  %s1784_s25 = sadd.s32 4294967295, %s1516_s17   ;;  %v1383_v0 = vld [vmem:[%s1763_s1] sm:$0xff]   ;;  %vm464_vm0 = vcmask 130048   ;;  %v1387_v4 = vld [vmem:[%s1765_s3 + $0x8] sm:$0xff]  }
  0x59   : > { %s1146_s14 = sshll.u32 %s1784_s25, 2  ;;  %1256 = vmatprep.subr.bf16.mxu0 %v1383_v0  ;;  %v1386_v3 = vld [vmem:[%s1765_s3] sm:$0xff]   ;;  %v1388_v5 = vld [vmem:[%s1765_s3 + $0x10] sm:$0xff]   ;;  %v1389_v6 = vld [vmem:[%s1765_s3 + $0x18] sm:$0xff]  }
  0x5a   : > { %p423_p3 = scmp.lt.s32.totalorder %s1146_s14, 7  ;;  %1257 = vmatpush3.bf16.msra.mxu0 %v1383_v0  ;;  %1262 = vmatprep.subr.bf16.mxu1 %v1386_v3  ;;  %v1390_v7 = vld [vmem:[%s1765_s3 + $0x20] sm:$0xff]   ;;  %v1391_v8 = vld [vmem:[%s1765_s3 + $0x28] sm:$0xff]   ;;  %v1392_v9 = vld [vmem:[%s1765_s3 + $0x30] sm:$0xff]  }
  0x5b   : > { %1263 = vmatpush3.bf16.msra.mxu1 %v1386_v3  ;;  %v1393_v10 = vld [vmem:[%s1765_s3 + $0x38] sm:$0xff]   ;;  %v1394_v11 = vld [vmem:[#allocation2] sm:$0xff]   ;;  %v1395_v12 = vld [vmem:[#allocation2 + $0x8] sm:$0xff]  }
  0x5c   : > { %s1786_s14 = smov (!%p423_p3, %s1146_s14), 7  ;;  %1264 = vmatprep.subr.bf16.mxu1 %v1387_v4  ;;  %1282 = vmatprep.subr.bf16.mxu0 %v1394_v11  ;;  %v1396_v13 = vld [vmem:[#allocation2 + $0x10] sm:$0xff]   ;;  %v1397_v14 = vld [vmem:[#allocation2 + $0x18] sm:$0xff]   ;;  %v1398_v15 = vld [vmem:[#allocation2 + $0x20] sm:$0xff]  }
  0x5d   : > { %s1147_s20 = sshll.u32 %s1786_s14, 2  ;;  %v1399_v16 = vld [vmem:[#allocation2 + $0x28] sm:$0xff]   ;;  %v1150_v17 = vld [vmem:[%s1764_s2] ss:$0 sm:$0xff]  ;;  %v1400_v32 = vld [vmem:[#allocation2 + $0x30] sm:$0xff]  }
  0x5e   : > { %s426_s26 = scalar_lea.vmem %s1762_s0, %s1147_s20  ;;  %v1401_v33 = vld [vmem:[#allocation2 + $0x38] sm:$0xff]   ;;  %v1402_v34 = vld [vmem:[#allocation4] sm:$0xff]   ;;  %v1403_v35 = vld [vmem:[#allocation4 + $0x8] sm:$0xff]   ;;  %s432_s23 = scalar_lea.vmem %s1773_s11, %s1147_s20 }
  0x5f   : > { %v1384_v1 = vld [vmem:[%s426_s26] sm:$0xff]   ;;  %v1385_v2 = vld [vmem:[%s426_s26 + $0x8] sm:$0xff]   ;;  %1265 = vmatpush3.bf16.msra.mxu1 %v1387_v4  ;;  %v1404_v36 = vld [vmem:[#allocation4 + $0x10] sm:$0xff]  }
  0x60   : > { %1258 = vmatprep.mubr.msk.bf16.mxu0 %vm464_vm0, %v1384_v1  ;;  %1266 = vmatprep.subr.bf16.mxu1 %v1388_v5  ;;  %v1405_v37 = vld [vmem:[#allocation4 + $0x18] sm:$0xff]   ;;  %v1406_v38 = vld [vmem:[#allocation4 + $0x20] sm:$0xff]   ;;  %v1407_v39 = vld [vmem:[#allocation4 + $0x28] sm:$0xff]  }
  0x61   : > { %1259 = vmatmul.mubr.msk.bf16.vlgmr.msra.gmra.mrb[0].mxu0 %vm464_vm0, %v1385_v2  ;;  %v1156_v40 = vld [vmem:[%s1766_s4] ss:$0 sm:$0xff]  ;;  %v1408_v55 = vld [vmem:[#allocation4 + $0x30] sm:$0xff]   ;;  %v1409_v56 = vld [vmem:[#allocation4 + $0x38] sm:$0xff]  }
  0x62   : > { %1283 = vmatpush3.bf16.msra.mxu0 %v1394_v11  ;;  %v1410_v57 = vld [vmem:[#allocation6] sm:$0xff]   ;;  %v1411_v58 = vld [vmem:[#allocation6 + $0x8] sm:$0xff]   ;;  %v1412_v59 = vld [vmem:[#allocation6 + $0x10] sm:$0xff]  }
  0x63   : > { %1267 = vmatpush3.bf16.msra.mxu1 %v1388_v5  ;;  %1284 = vmatprep.subr.bf16.mxu0 %v1395_v12  ;;  %v1413_v60 = vld [vmem:[#allocation6 + $0x18] sm:$0xff]   ;;  %v1414_v61 = vld [vmem:[#allocation6 + $0x20] sm:$0xff]   ;;  %v1415_v62 = vld [vmem:[#allocation6 + $0x28] sm:$0xff]  }
  0x64   : > { %1268 = vmatprep.subr.bf16.mxu1 %v1389_v6  ;;  %v1165_v63 = vld [vmem:[%s1768_s6] ss:$0 sm:$0xff] }
  0x66   : > { %1285 = vmatpush3.bf16.msra.mxu0 %v1395_v12 }
  0x67   : > { %1269 = vmatpush3.bf16.msra.mxu1 %v1389_v6  ;;  %1286 = vmatprep.subr.bf16.mxu0 %v1396_v13 }
  0x68   : > { %1270 = vmatprep.subr.bf16.mxu1 %v1390_v7 }
  0x6a   : > { %1287 = vmatpush3.bf16.msra.mxu0 %v1396_v13 }
  0x6b   : > { %1271 = vmatpush3.bf16.msra.mxu1 %v1390_v7  ;;  %1288 = vmatprep.subr.bf16.mxu0 %v1397_v14 }
  0x6c   : > { %1272 = vmatprep.subr.bf16.mxu1 %v1391_v8 }
  0x6e   : > { %1289 = vmatpush3.bf16.msra.mxu0 %v1397_v14  ;;  %v1416_v14 = vld [vmem:[#allocation6 + $0x30] sm:$0xff]  }
  0x6f   : > { %1273 = vmatpush3.bf16.msra.mxu1 %v1391_v8  ;;  %1290 = vmatprep.subr.bf16.mxu0 %v1398_v15 }
  0x70   : > { %1274 = vmatprep.subr.bf16.mxu1 %v1392_v9 }
  0x72   : > { %1291 = vmatpush3.bf16.msra.mxu0 %v1398_v15  ;;  %v1417_v15 = vld [vmem:[#allocation6 + $0x38] sm:$0xff]  }
  0x73   : > { %1275 = vmatpush3.bf16.msra.mxu1 %v1392_v9  ;;  %1292 = vmatprep.subr.bf16.mxu0 %v1399_v16 }
  0x74   : > { %1276 = vmatprep.subr.bf16.mxu1 %v1393_v10 }
  0x76   : > { %1293 = vmatpush3.bf16.msra.mxu0 %v1399_v16  ;;  %v1174_v16 = vld [vmem:[%s1770_s8] ss:$0 sm:$0xff] }
  0x77   : > { %1277 = vmatpush3.bf16.msra.mxu1 %v1393_v10  ;;  %1294 = vmatprep.subr.bf16.mxu0 %v1400_v32 }
  0x78   : > { %1302 = vmatprep.subr.bf16.mxu1 %v1402_v34 }
  0x7a   : > { %1295 = vmatpush3.bf16.msra.mxu0 %v1400_v32 }
  0x7b   : > { %1296 = vmatprep.subr.bf16.mxu0 %v1401_v33 }
  0x7e   : > { %1297 = vmatpush3.bf16.msra.mxu0 %v1401_v33 }
  0x7f   : > { %1322 = vmatprep.subr.bf16.mxu0 %v1410_v57 }
 0x134   : > { %v1260_v18 = vpop.f32.mrb[0].mxu0 }
 0x135   : > { %v514_v19 = vadd.f32 %v1260_v18, %v1150_v17  ;;  %v505_v20 = vpop.f32.mrb[1].mxu0 }
 0x136   : > { %v506_v21 = vadd.f32 %v1150_v17, %v505_v20  ;;  %v1261_v22 = vpop.f32.mrb[2].mxu0 }
 0x137   : > { %v517_v23 = vadd.f32 %v1261_v22, %v1150_v17  ;;  %v508_v24 = vpop.f32.mrb[3].mxu0  ;;  %v522_v26 = vmax.f32 %v514_v19, 0.0 }
 0x138   : > { %v509_v25 = vadd.f32 %v1150_v17, %v508_v24  ;;  %v520_v28 = vmax.f32 %v506_v21, 0.0 }
 0x139   : > { %v523_v27 = vmax.f32 %v517_v23, 0.0 }
 0x13a   : > { %v521_v29 = vmax.f32 %v509_v25, 0.0 }
 0x13b   : > { %v525_v30 = vpack.c.bf16 %v523_v27, %v522_v26 }
 0x13c   : > { %v524_v31 = vpack.c.bf16 %v521_v29, %v520_v28 }
 0x13e   : > { %1278 = vmatprep.mubr.bf16.mxu1 %v524_v31  ;;  %v1183_v31 = vld [vmem:[%s1772_s10] ss:$0 sm:$0xff] }
 0x13f   : > { %1279 = vmatmul.mubr.bf16.vlgmr.msra.gmra.mrb[0].mxu1 %v525_v30 }
 0x140   : > { %1303 = vmatpush3.bf16.msra.mxu1 %v1402_v34 }
 0x141   : > { %1304 = vmatprep.subr.bf16.mxu1 %v1403_v35 }
 0x144   : > { %1305 = vmatpush3.bf16.msra.mxu1 %v1403_v35 }
 0x145   : > { %1306 = vmatprep.subr.bf16.mxu1 %v1404_v36 }
 0x148   : > { %1307 = vmatpush3.bf16.msra.mxu1 %v1404_v36 }
 0x149   : > { %1308 = vmatprep.subr.bf16.mxu1 %v1405_v37 }
 0x14c   : > { %1309 = vmatpush3.bf16.msra.mxu1 %v1405_v37 }
 0x14d   : > { %1310 = vmatprep.subr.bf16.mxu1 %v1406_v38 }
 0x150   : > { %1311 = vmatpush3.bf16.msra.mxu1 %v1406_v38 }
 0x151   : > { %1312 = vmatprep.subr.bf16.mxu1 %v1407_v39 }
 0x154   : > { %1313 = vmatpush3.bf16.msra.mxu1 %v1407_v39 }
 0x155   : > { %1314 = vmatprep.subr.bf16.mxu1 %v1408_v55 }
 0x158   : > { %1315 = vmatpush3.bf16.msra.mxu1 %v1408_v55 }
 0x159   : > { %1316 = vmatprep.subr.bf16.mxu1 %v1409_v56 }
 0x15c   : > { %1317 = vmatpush3.bf16.msra.mxu1 %v1409_v56 }
 0x212   : > { %v1280_v41 = vpop.f32.mrb[0].mxu1 }
 0x213   : > { %v640_v42 = vadd.f32 %v1280_v41, %v1156_v40  ;;  %v631_v43 = vpop.f32.mrb[1].mxu1 }
 0x214   : > { %v632_v44 = vadd.f32 %v1156_v40, %v631_v43  ;;  %v1281_v45 = vpop.f32.mrb[2].mxu1 }
 0x215   : > { %v643_v46 = vadd.f32 %v1281_v45, %v1156_v40  ;;  %v634_v47 = vpop.f32.mrb[3].mxu1  ;;  %v648_v49 = vmax.f32 %v640_v42, 0.0 }
 0x216   : > { %v635_v48 = vadd.f32 %v1156_v40, %v634_v47  ;;  %v646_v51 = vmax.f32 %v632_v44, 0.0 }
 0x217   : > { %v649_v50 = vmax.f32 %v643_v46, 0.0 }
 0x218   : > { %v647_v52 = vmax.f32 %v635_v48, 0.0 }
 0x219   : > { %v651_v53 = vpack.c.bf16 %v649_v50, %v648_v49 }
 0x21a   : > { %v650_v54 = vpack.c.bf16 %v647_v52, %v646_v51 }
 0x21c   : > { %1298 = vmatprep.mubr.bf16.mxu0 %v650_v54 }
 0x21d   : > { %1299 = vmatmul.mubr.bf16.vlgmr.msra.gmra.mrb[4].mxu0 %v651_v53 }
 0x21e   : > { %1323 = vmatpush3.bf16.msra.mxu0 %v1410_v57 }
 0x21f   : > { %1324 = vmatprep.subr.bf16.mxu0 %v1411_v58 }
 0x222   : > { %1325 = vmatpush3.bf16.msra.mxu0 %v1411_v58 }
 0x223   : > { %1326 = vmatprep.subr.bf16.mxu0 %v1412_v59 }
 0x226   : > { %1327 = vmatpush3.bf16.msra.mxu0 %v1412_v59 }
 0x227   : > { %1328 = vmatprep.subr.bf16.mxu0 %v1413_v60 }
 0x22a   : > { %1329 = vmatpush3.bf16.msra.mxu0 %v1413_v60 }
 0x22b   : > { %1330 = vmatprep.subr.bf16.mxu0 %v1414_v61 }
 0x22e   : > { %1331 = vmatpush3.bf16.msra.mxu0 %v1414_v61 }
 0x22f   : > { %1332 = vmatprep.subr.bf16.mxu0 %v1415_v62 }
 0x232   : > { %1333 = vmatpush3.bf16.msra.mxu0 %v1415_v62 }
 0x233   : > { %1334 = vmatprep.subr.bf16.mxu0 %v1416_v14 }
 0x236   : > { %1335 = vmatpush3.bf16.msra.mxu0 %v1416_v14 }
 0x237   : > { %1336 = vmatprep.subr.bf16.mxu0 %v1417_v15 }
 0x23a   : > { %1337 = vmatpush3.bf16.msra.mxu0 %v1417_v15 }
 0x2f0   : > { %v1300_v0 = vpop.f32.mrb[4].mxu0 }
 0x2f1   : > { %v766_v1 = vadd.f32 %v1300_v0, %v1165_v63  ;;  %v757_v2 = vpop.f32.mrb[5].mxu0 }
 0x2f2   : > { %v758_v3 = vadd.f32 %v1165_v63, %v757_v2  ;;  %v1301_v4 = vpop.f32.mrb[6].mxu0 }
 0x2f3   : > { %v769_v5 = vadd.f32 %v1301_v4, %v1165_v63  ;;  %v760_v6 = vpop.f32.mrb[7].mxu0  ;;  %v774_v8 = vmax.f32 %v766_v1, 0.0 }
 0x2f4   : > { %v761_v7 = vadd.f32 %v1165_v63, %v760_v6  ;;  %v772_v10 = vmax.f32 %v758_v3, 0.0 }
 0x2f5   : > { %v775_v9 = vmax.f32 %v769_v5, 0.0 }
 0x2f6   : > { %v773_v11 = vmax.f32 %v761_v7, 0.0 }
 0x2f7   : > { %v777_v12 = vpack.c.bf16 %v775_v9, %v774_v8 }
 0x2f8   : > { %v776_v13 = vpack.c.bf16 %v773_v11, %v772_v10 }
 0x2fa   : > { %1318 = vmatprep.mubr.bf16.mxu1 %v776_v13 }
 0x2fb   : > { %1319 = vmatmul.mubr.bf16.vlgmr.msra.gmra.mrb[4].mxu1 %v777_v12 }
 0x3ce   : > { %v1320_v17 = vpop.f32.mrb[4].mxu1 }
 0x3cf   : > { %v892_v18 = vadd.f32 %v1320_v17, %v1174_v16  ;;  %v883_v19 = vpop.f32.mrb[5].mxu1 }
 0x3d0   : > { %v884_v20 = vadd.f32 %v1174_v16, %v883_v19  ;;  %v1321_v21 = vpop.f32.mrb[6].mxu1 }
 0x3d1   : > { %v895_v22 = vadd.f32 %v1321_v21, %v1174_v16  ;;  %v886_v23 = vpop.f32.mrb[7].mxu1  ;;  %v900_v25 = vmax.f32 %v892_v18, 0.0 }
 0x3d2   : > { %v887_v24 = vadd.f32 %v1174_v16, %v886_v23  ;;  %v898_v27 = vmax.f32 %v884_v20, 0.0 }
 0x3d3   : > { %v901_v26 = vmax.f32 %v895_v22, 0.0 }
 0x3d4   : > { %v899_v28 = vmax.f32 %v887_v24, 0.0 }
 0x3d5   : > { %v903_v29 = vpack.c.bf16 %v901_v26, %v900_v25 }
 0x3d6   : > { %v902_v30 = vpack.c.bf16 %v899_v28, %v898_v27 }
 0x3d8   : > { %1338 = vmatprep.mubr.bf16.mxu0 %v902_v30 }
 0x3d9   : > { %1339 = vmatmul.mubr.bf16.vlgmr.msra.gmra.mrb[8].mxu0 %v903_v29 }
 0x4ac   : > { %v1340_v32 = vpop.f32.mrb[8].mxu0 }
 0x4ad   : > { %v1018_v33 = vadd.f32 %v1340_v32, %v1183_v31  ;;  %v1009_v34 = vpop.f32.mrb[9].mxu0 }
 0x4ae   : > { %v1010_v35 = vadd.f32 %v1183_v31, %v1009_v34  ;;  %v1341_v36 = vpop.f32.mrb[10].mxu0 }
 0x4af   : > { %v1021_v37 = vadd.f32 %v1341_v36, %v1183_v31  ;;  %v1012_v38 = vpop.f32.mrb[11].mxu0  ;;  %v1026_v40 = vmax.f32 %v1018_v33, 0.0 }
 0x4b0   : > { %v1013_v39 = vadd.f32 %v1183_v31, %v1012_v38  ;;  %v1024_v42 = vmax.f32 %v1010_v35, 0.0 }
 0x4b1   : > { %v1027_v41 = vmax.f32 %v1021_v37, 0.0 }
 0x4b2   : > { %v1025_v43 = vmax.f32 %v1013_v39, 0.0 }
 0x4b3   : > { %v1210_v44 = vpack.c.bf16 %v1027_v41, %v1026_v40 }
 0x4b4   : > { %v1205_v45 = vpack.c.bf16 %v1025_v43, %v1024_v42 }
 0x4b5   : > { %1212 = vst [vmem:[%s432_s23 + $0x8] sm:$0xff] %v1210_v44  }
 0x4b6   : > { %1206 = vst [vmem:[%s432_s23] sm:$0xff] %v1205_v45  }
 0x4b7 PF: > { %s23_s17 = sadd.s32 1, %s1516_s17  }
 0x4b8   : > { %p20_p5 = scmp.ge.s32.totalorder %s23_s17, 4  }
 0x4ba   :  { %22 = sbr.rel (!%p20_p5) target bundleno = 2 (0x2), region = 107 }
 0x4c1   :  { %1070 = vsyncpa [#allocation3], 1 }
 0x4c2   :  { %1072 = vsyncpa [#allocation3 + $0x1], 1 }
 0x4c3   :  { %1073 = vsyncpa [#allocation5], 1 }

</bundles_post_ra>
